<compile_context>
chip_gen: v7x
topology: tpu7x:2x2x1
jax: 0.10.0
libtpu: 0.0.40
codegen_flags: <defaults>
</compile_context>

<pallas_src>
import functools

import jax
import jax.numpy as jnp
from jax import lax
from jax.experimental import pallas as pl
from jax.experimental.pallas import tpu as pltpu


_EPS = 1e-12            # F.normalize-style guard against zero-norm rows
_LOGIT_SCALE = 1.0 / 0.07


def _round_up(x, m):
    return (x + m - 1) // m * m


def _action_head_kernel(x_ref, pif_ref, r_ref, t_nsq_ref, out_ref,
                        *, d, k_pad, mm_dtype):
    # x = x/2 + prompt_iFeature/2
    x = (x_ref[...] + pif_ref[...]) * 0.5                          # (TB, D) f32

    # Single fused MXU matmul against R = [Wc | t^T | Wc @ t^T]:
    #   y[:,      :D      ] = prompt = x @ Wc
    #   y[:, D    :D+K    ] = x·t_k            (un-normalized x)
    #   y[:, D+K  :D+2K   ] = prompt·t_k
    y = jnp.dot(x.astype(mm_dtype), r_ref[...],
                preferred_element_type=jnp.float32)                # (TB, D+2K) f32
    prompt = y[:, :d]                                              # 128-aligned slices
    xt = y[:, d:d + k_pad]
    pt = y[:, d + k_pad:d + 2 * k_pad]

    # Per-row scalars (all f32 on VPU/XLU/EUP; v5e has no bf16 VALU/EUP).
    x_nsq = jnp.sum(x * x, axis=-1, keepdims=True)                 # ||x||^2
    inv_xn = lax.rsqrt(x_nsq + _EPS)                               # 1/||x||
    xp = jnp.sum(x * prompt, axis=-1, keepdims=True)               # x·prompt
    p_nsq = jnp.sum(prompt * prompt, axis=-1, keepdims=True)       # ||prompt||^2

    # logits[b,k] = (x·t_k + x·p_b) / (||x_b|| sqrt(||t_k||^2 + 2 p_b·t_k + ||p_b||^2))
    num = (xt + xp) * inv_xn                                       # (TB, K)
    den_sq = jnp.maximum(t_nsq_ref[...] + 2.0 * pt + p_nsq, 0.0)   # cancellation guard
    logits = num * lax.rsqrt(den_sq + _EPS) * _LOGIT_SCALE
    out_ref[...] = logits.astype(out_ref.dtype)


def prepare_action_head_weights(t_feature, w_v, w_o, alpha,
                                *, matmul_dtype=jnp.bfloat16):
    """One-time (per checkpoint / per text-feature set) weight preparation.

    Hoisted off the per-call hot path: the D^3 fusion matmul and the text
    feature padding/transpose dwarf the per-call kernel work at small B.
    Returns a dict of static operands for roi_action_head_logits.
    """
    K, D = t_feature.shape
    assert D % 128 == 0, "embed dim must be a multiple of 128"
    K_pad = _round_up(K, 128)

    # Wc = (Wv @ Wo) * alpha  (alpha is a per-output-dim scale, (1, D)).
    wc = ((w_v.astype(jnp.float32) @ w_o.astype(jnp.float32))
          * alpha.astype(jnp.float32))                                   # (D, D) f32

    t_f32 = t_feature.astype(jnp.float32)
    tT = jnp.pad(t_f32, ((0, K_pad - K), (0, 0))).T                      # (D, K_pad) f32
    w2 = wc @ tT                                                         # (D, K_pad) f32 product

    # Fused RHS with 128-aligned column groups: [Wc | t^T | Wc @ t^T]; cast once.
    r = jnp.concatenate([wc, tT, w2], axis=1).astype(matmul_dtype)       # (D, D+2*K_pad)

    t_nsq = jnp.sum(t_f32 * t_f32, axis=-1)                              # ||t_k||^2
    t_nsq = jnp.pad(t_nsq, (0, K_pad - K)).reshape(1, K_pad)             # (1, K_pad)

    return {"r": r, "t_nsq": t_nsq, "K": K, "K_pad": K_pad, "D": D,
            "mm_dtype": matmul_dtype}


def roi_action_head_logits(x, prompt_ifeature, prepared):
    """Hot path. x, prompt_ifeature: (B, D). Returns (B, K) float32 logits."""
    B, D = x.shape
    assert D == prepared["D"]
    K, K_pad = prepared["K"], prepared["K_pad"]
    mm_dtype = prepared["mm_dtype"]
    r, t_nsq = prepared["r"], prepared["t_nsq"]
    width = D + 2 * K_pad

    # Tile over boxes: big tiles (<=256 rows) amortize the ~0.35us/step overhead
    # and feed the 256-wide MXU on v6e/v7x; when more than one tile is needed,
    # keep the grid length even so ("parallel",) shards across both v7x TCs.
    B8 = _round_up(B, 8)
    tile_b = min(256, B8)
    num_tiles = -(-B8 // tile_b)
    if num_tiles > 1 and num_tiles % 2:
        num_tiles += 1
        tile_b = _round_up(-(-B8 // num_tiles), 8)
    b_pad = tile_b * num_tiles

    x_p = jnp.pad(x.astype(jnp.float32), ((0, b_pad - B), (0, 0)))
    pif_p = jnp.pad(prompt_ifeature.astype(jnp.float32), ((0, b_pad - B), (0, 0)))

    # Accurate VMEM budget (no 16/48 MiB heuristic): real footprint is ~1 MiB.
    itm = jnp.dtype(mm_dtype).itemsize
    footprint = (
        2 * 2 * tile_b * D * 4         # x, pif blocks (double-buffered, f32)
        + 2 * D * width * itm          # fused RHS (grid-invariant)
        + 2 * 8 * K_pad * 4            # ||t_k||^2 row (sublane-padded)
        + 2 * tile_b * K_pad * 4       # output block (double-buffered)
        + tile_b * width * 4           # in-kernel f32 matmul result
    )
    vmem_limit = int(2 * footprint + (2 << 20))   # headroom for compiler scratch

    kernel = functools.partial(_action_head_kernel,
                               d=D, k_pad=K_pad, mm_dtype=mm_dtype)

    out = pl.pallas_call(
        kernel,
        out_shape=jax.ShapeDtypeStruct((b_pad, K_pad), jnp.float32),
        grid_spec=pltpu.PrefetchScalarGridSpec(
            num_scalar_prefetch=0,
            grid=(num_tiles,),
            in_specs=[
                pl.BlockSpec((tile_b, D), lambda i: (i, 0)),    # x
                pl.BlockSpec((tile_b, D), lambda i: (i, 0)),    # prompt_iFeature
                pl.BlockSpec((D, width), lambda i: (0, 0)),     # fused [Wc|t^T|Wc t^T]
                pl.BlockSpec((1, K_pad), lambda i: (0, 0)),     # ||t_k||^2
            ],
            out_specs=pl.BlockSpec((tile_b, K_pad), lambda i: (i, 0)),
        ),
        compiler_params=pltpu.CompilerParams(
            dimension_semantics=("parallel",),
            vmem_limit_bytes=vmem_limit,
        ),
    )(x_p, pif_p, r, t_nsq)

    return out[:B, :K]


def _reference(x, pif, t, wv, wo, alpha):
    """Pure-JAX f32 reference matching the PyTorch module tail."""
    x = x * 0.5 + pif * 0.5
    prompt = alpha * ((x @ wv) @ wo)
    tf = t[None, :, :] + prompt[:, None, :]
    x_n = x / jnp.linalg.norm(x, axis=-1, keepdims=True)
    tf_n = tf / jnp.linalg.norm(tf, axis=-1, keepdims=True)
    return jnp.einsum('bd,bkd->bk', x_n, tf_n) / 0.07


if __name__ == "__main__":
    B, K, D = 5, 11, 256   # boxes, action classes, embed dim (exercises padding)

    key = jax.random.PRNGKey(0)
    k1, k2, k3, k4, k5 = jax.random.split(key, 5)
    x = jax.random.normal(k1, (B, D), jnp.float32)                 # roi feature
    prompt_if = jax.random.normal(k2, (B, D), jnp.float32)         # prompt_iFeature
    t_feature = jax.random.normal(k3, (K, D), jnp.float32)         # text features
    w_v = jax.random.normal(k4, (D, D), jnp.float32) * 0.02        # prompt gen Wv
    w_o = jax.random.normal(k5, (D, D), jnp.float32) * 0.02        # prompt gen Wo
    alpha = jnp.full((1, D), 0.1, jnp.float32)                     # prompt gen alpha

    # One-time weight prep (off the hot path), then the per-call kernel.
    prepared = prepare_action_head_weights(t_feature, w_v, w_o, alpha)
    jax.block_until_ready(prepared["r"])

    logits = roi_action_head_logits(x, prompt_if, prepared)
    jax.block_until_ready(logits)

    ref = _reference(x, prompt_if, t_feature, w_v, w_o, alpha)
    assert logits.shape == (B, K)
    # bf16 MXU inputs with f32 accumulation -> tolerance looser than pure-f32.
    max_err = float(jnp.max(jnp.abs(logits - ref)))
    assert jnp.allclose(logits, ref, atol=5e-2, rtol=5e-2), max_err
    print("KERNEL_OK")
</pallas_src>

<mosaic_0001>
module attributes {stable_mosaic.version = 11 : i64} {
  func.func @_action_head_kernel(%arg0: i32, %arg1: memref<8x256xf32, #tpu.memory_space<vmem>>, %arg2: memref<8x256xf32, #tpu.memory_space<vmem>>, %arg3: memref<256x512xbf16, #tpu.memory_space<vmem>>, %arg4: memref<1x128xf32, #tpu.memory_space<vmem>>, %arg5: memref<8x128xf32, #tpu.memory_space<vmem>>) attributes {dimension_semantics = [#tpu.dimension_semantics<parallel>], iteration_bounds = array<i64: 1>, scalar_prefetch = 0 : i64, scratch_operands = 0 : i64, tpu.core_type = #tpu.core_type<tc>, window_params = [{transform_indices = @transform_0, window_bounds = array<i64: 8, 256>}, {transform_indices = @transform_1, window_bounds = array<i64: 8, 256>}, {pipeline_mode = #tpu.pipeline_mode<synchronous>, transform_indices = @transform_2, window_bounds = array<i64: 256, 512>}, {pipeline_mode = #tpu.pipeline_mode<synchronous>, transform_indices = @transform_3, window_bounds = array<i64: 1, 128>}, {transform_indices = @transform_4, window_bounds = array<i64: 8, 128>}]} {
    %c0 = arith.constant 0 : index
    %c0_0 = arith.constant 0 : index
    %0 = vector.load %arg1[%c0, %c0_0] : memref<8x256xf32, #tpu.memory_space<vmem>>, vector<8x256xf32>
    %c0_1 = arith.constant 0 : index
    %c0_2 = arith.constant 0 : index
    %1 = vector.load %arg2[%c0_1, %c0_2] : memref<8x256xf32, #tpu.memory_space<vmem>>, vector<8x256xf32>
    %2 = arith.addf %0, %1 : vector<8x256xf32>
    %cst = arith.constant 5.000000e-01 : f32
    %3 = vector.broadcast %cst : f32 to vector<8x256xf32>
    %4 = arith.mulf %2, %3 : vector<8x256xf32>
    %5 = arith.truncf %4 : vector<8x256xf32> to vector<8x256xbf16>
    %c0_3 = arith.constant 0 : index
    %c0_4 = arith.constant 0 : index
    %6 = vector.load %arg3[%c0_3, %c0_4] : memref<256x512xbf16, #tpu.memory_space<vmem>>, vector<256x512xbf16>
    %cst_5 = arith.constant dense<0.000000e+00> : vector<8x512xf32>
    %7 = tpu.matmul %5, %6, %cst_5 {dimension_numbers = #tpu.dot_dimension_numbers<[1], [0], [0], [1], [0, 0, 1, 1], [], []>} : vector<8x256xbf16>, vector<256x512xbf16>, vector<8x512xf32> -> vector<8x512xf32>
    %8 = vector.extract_strided_slice %7 {offsets = [0, 0], sizes = [8, 256], strides = [1, 1]} : vector<8x512xf32> to vector<8x256xf32>
    %9 = vector.extract_strided_slice %7 {offsets = [0, 256], sizes = [8, 128], strides = [1, 1]} : vector<8x512xf32> to vector<8x128xf32>
    %10 = vector.extract_strided_slice %7 {offsets = [0, 384], sizes = [8, 128], strides = [1, 1]} : vector<8x512xf32> to vector<8x128xf32>
    %11 = arith.mulf %4, %4 : vector<8x256xf32>
    %cst_6 = arith.constant dense<0.000000e+00> : vector<8xf32>
    %12 = vector.multi_reduction <add>, %11, %cst_6 [1] : vector<8x256xf32> to vector<8xf32>
    %13 = vector.shape_cast %12 : vector<8xf32> to vector<8x1xf32>
    %cst_7 = arith.constant 9.99999996E-13 : f32
    %14 = vector.broadcast %cst_7 : f32 to vector<8x1xf32>
    %15 = arith.addf %13, %14 : vector<8x1xf32>
    %16 = math.rsqrt %15 : vector<8x1xf32>
    %17 = arith.mulf %4, %8 : vector<8x256xf32>
    %cst_8 = arith.constant dense<0.000000e+00> : vector<8xf32>
    %18 = vector.multi_reduction <add>, %17, %cst_8 [1] : vector<8x256xf32> to vector<8xf32>
    %19 = vector.shape_cast %18 : vector<8xf32> to vector<8x1xf32>
    %20 = arith.mulf %8, %8 : vector<8x256xf32>
    %cst_9 = arith.constant dense<0.000000e+00> : vector<8xf32>
    %21 = vector.multi_reduction <add>, %20, %cst_9 [1] : vector<8x256xf32> to vector<8xf32>
    %22 = vector.shape_cast %21 : vector<8xf32> to vector<8x1xf32>
    %23 = vector.broadcast %19 : vector<8x1xf32> to vector<8x128xf32>
    %24 = arith.addf %9, %23 : vector<8x128xf32>
    %25 = vector.broadcast %16 : vector<8x1xf32> to vector<8x128xf32>
    %26 = arith.mulf %24, %25 : vector<8x128xf32>
    %c0_10 = arith.constant 0 : index
    %c0_11 = arith.constant 0 : index
    %27 = vector.load %arg4[%c0_10, %c0_11] : memref<1x128xf32, #tpu.memory_space<vmem>>, vector<1x128xf32>
    %cst_12 = arith.constant 2.000000e+00 : f32
    %28 = vector.broadcast %cst_12 : f32 to vector<8x128xf32>
    %29 = arith.mulf %28, %10 : vector<8x128xf32>
    %30 = vector.broadcast %27 : vector<1x128xf32> to vector<8x128xf32>
    %31 = arith.addf %30, %29 : vector<8x128xf32>
    %32 = vector.broadcast %22 : vector<8x1xf32> to vector<8x128xf32>
    %33 = arith.addf %31, %32 : vector<8x128xf32>
    %cst_13 = arith.constant 0.000000e+00 : f32
    %34 = vector.broadcast %cst_13 : f32 to vector<8x128xf32>
    %35 = arith.maximumf %33, %34 : vector<8x128xf32>
    %cst_14 = arith.constant 9.99999996E-13 : f32
    %36 = vector.broadcast %cst_14 : f32 to vector<8x128xf32>
    %37 = arith.addf %35, %36 : vector<8x128xf32>
    %38 = math.rsqrt %37 : vector<8x128xf32>
    %39 = arith.mulf %26, %38 : vector<8x128xf32>
    %cst_15 = arith.constant 14.2857141 : f32
    %40 = vector.broadcast %cst_15 : f32 to vector<8x128xf32>
    %41 = arith.mulf %39, %40 : vector<8x128xf32>
    %c0_16 = arith.constant 0 : index
    %c0_17 = arith.constant 0 : index
    %42 = vector.load %arg5[%c0_16, %c0_17] : memref<8x128xf32, #tpu.memory_space<vmem>>, vector<8x128xf32>
    tpu.vector_store %arg5[%c0_16, %c0_17], %41 {strides = array<i32>} : memref<8x128xf32, #tpu.memory_space<vmem>>, vector<8x128xf32>,
    return
  }
  func.func @transform_0(%arg0: i32) -> (i32, i32) {
    %c0_i32 = arith.constant 0 : i32
    %c0_i32_0 = arith.constant 0 : i32
    return %arg0, %c0_i32 : i32, i32
  }
  func.func @transform_1(%arg0: i32) -> (i32, i32) {
    %c0_i32 = arith.constant 0 : i32
    %c0_i32_0 = arith.constant 0 : i32
    return %arg0, %c0_i32 : i32, i32
  }
  func.func @transform_2(%arg0: i32) -> (i32, i32) {
    %c0_i32 = arith.constant 0 : i32
    %c0_i32_0 = arith.constant 0 : i32
    %c0_i32_1 = arith.constant 0 : i32
    return %c0_i32, %c0_i32_0 : i32, i32
  }
  func.func @transform_3(%arg0: i32) -> (i32, i32) {
    %c0_i32 = arith.constant 0 : i32
    %c0_i32_0 = arith.constant 0 : i32
    %c0_i32_1 = arith.constant 0 : i32
    return %c0_i32, %c0_i32_0 : i32, i32
  }
  func.func @transform_4(%arg0: i32) -> (i32, i32) {
    %c0_i32 = arith.constant 0 : i32
    %c0_i32_0 = arith.constant 0 : i32
    return %arg0, %c0_i32 : i32, i32
  }
}

</mosaic_0001>

<bundles_post_ra>
// kernel: tpu_custom_call.1
= control target key start
LH: loop header
LB: loop body
LE: loop exit
PB: predicated region body
PF: predicated region fallthrough
CT: control target
= control target key end

     0   :  { %9 = vsyncpa [#allocation3], 0  ;;  %s936_s0 = inlined_call_operand.hbm [shape: f32[8,256], index: 0, kind: input, shape index: {}]   ;;  %s937_s1 = inlined_call_operand.hbm [shape: f32[8,256], index: 1, kind: input, shape index: {}]   ;;  %s938_s2 = inlined_call_operand.hbm [shape: bf16[256,512], index: 2, kind: input, shape index: {}]   ;;  %s939_s3 = inlined_call_operand.vmem [shape: f32[1,128], index: 3, kind: input, shape index: {}]   ;;  %s940_s4 = inlined_call_operand.hbm [shape: f32[8,128], index: 4, kind: output, shape index: {}]  }
   0x1   :  { %10 = vsyncpa [#allocation6], 0 }
   0x2   :  { %11 = vsyncpa [#allocation4], 0  ;;  %s847_s15 = smov [#allocation5]   ;;  %s848_s17 = smov [#allocation2]  }
   0x3   :  { %s28_s16 = sshll.u32 %s847_s15, 4  ;;  %s18_s18 = sshll.u32 %s848_s17, 4  ;;  %s29_s16 = int_to_ptr.vmem [resolvable:$true] %s28_s16  ;;  %s19_s18 = int_to_ptr.vmem [resolvable:$true] %s18_s18 }
   0x4   :  { %s753_s21 = scalar_lea.hbm %s937_s1, 256 }
   0x5   :  { %p754_p0 = scmp.ne.s32.totalorder %s937_s1, %s753_s21  ;;  %p757_p1 = scmp.lt.u32.totalorder %s753_s21, %s937_s1 }
   0x7   :  { %p759_p2 = pnand %p757_p1, %p754_p0 }
   0x9   :  { %762 = shalt.err (!%p759_p2)
}
   0xa   :  { %s763_s26 = scalar_lea.vmem %s29_s16, 256  ;;  %p768_p4 = scmp.lt.s32.totalorder %s29_s16, %s29_s16 }
   0xb   :  { %p764_p3 = scmp.ne.s32.totalorder %s29_s16, %s763_s26  ;;  %p769_p5 = scmp.lt.s32.totalorder %s763_s26, %s763_s26 }
   0xd   :  { %p770_p6 = por %p769_p5, %p768_p4 }
   0xf   :  { %p771_p7 = pnand %p770_p6, %p764_p3 }
  0x11   :  { %774 = shalt.err (!%p771_p7)
}
  0x12   :  { %31 = dma.hbm_to_vmem [thread:$0]  %s937_s1, 256, %s29_s16, [#allocation6]  }
  0x13   :  { %s775_s5 = scalar_lea.hbm %s936_s0, 256 }
  0x14   :  { %p776_p8 = scmp.ne.s32.totalorder %s936_s0, %s775_s5  ;;  %p779_p9 = scmp.lt.u32.totalorder %s775_s5, %s936_s0 }
  0x16   :  { %p781_p10 = pnand %p779_p9, %p776_p8 }
  0x18   :  { %784 = shalt.err (!%p781_p10)
}
  0x19   :  { %s785_s10 = scalar_lea.vmem %s19_s18, 256  ;;  %p790_p12 = scmp.lt.s32.totalorder %s19_s18, %s19_s18 }
  0x1a   :  { %p786_p11 = scmp.ne.s32.totalorder %s19_s18, %s785_s10  ;;  %p791_p13 = scmp.lt.s32.totalorder %s785_s10, %s785_s10 }
  0x1c   :  { %p792_p0 = por %p791_p13, %p790_p12 }
  0x1e   :  { %p793_p1 = pnand %p792_p0, %p786_p11 }
  0x20   :  { %796 = shalt.err (!%p793_p1)
}
  0x21   :  { %21 = dma.hbm_to_vmem [thread:$0]  %s936_s0, 256, %s19_s18, [#allocation3]  }
  0x22   :  { %s849_s12 = smov [#allocation7]   ;;  %s797_s16 = scalar_lea.hbm %s938_s2, 8192 }
  0x23   :  { %s37_s13 = sshll.u32 %s849_s12, 4  ;;  %p798_p2 = scmp.ne.s32.totalorder %s938_s2, %s797_s16  ;;  %s38_s13 = int_to_ptr.vmem [resolvable:$true] %s37_s13 }
  0x24   :  { %p801_p3 = scmp.lt.u32.totalorder %s797_s16, %s938_s2 }
  0x26   :  { %p803_p4 = pnand %p801_p3, %p798_p2 }
  0x28   :  { %806 = shalt.err (!%p803_p4)
}
  0x29   :  { %s807_s22 = scalar_lea.vmem %s38_s13, 8192  ;;  %p812_p6 = scmp.lt.s32.totalorder %s38_s13, %s38_s13 }
  0x2a   :  { %p808_p5 = scmp.ne.s32.totalorder %s38_s13, %s807_s22  ;;  %p813_p7 = scmp.lt.s32.totalorder %s807_s22, %s807_s22 }
  0x2c   :  { %p814_p8 = por %p813_p7, %p812_p6 }
  0x2e   :  { %p815_p9 = pnand %p814_p8, %p808_p5 }
  0x30   :  { %818 = shalt.err (!%p815_p9)
}
  0x31   :  { %s850_s0 = smov 256   ;;  %s851_s18 = smov 16  }
  0x32   :  { %43 = dma.hbm_to_vmem [thread:$0]  %s938_s2, 8192, %s38_s13, [#allocation6], %s850_s0, %s850_s0, %s851_s18  }
  0x33   :  { %841 = dma.done.wait [#allocation3], 256  }
  0x34   :  { %842 = vsyncadd [#allocation3], 4294967040 }
  0x35   :  { %843 = dma.done.wait [#allocation6], 8448  }
  0x36   :  { %844 = vsyncadd [#allocation6], 4294958848  ;;  %v653_v0 = vld [vmem:[#allocation7 + $0x4] ss:$16 sps:$4 sm:$0xff]   ;;  %v655_v1 = vld [vmem:[#allocation7] ss:$16 sps:$4 sm:$0xff]  }
  0x37   :  { %449 = vmatprep.subr.bf16.mxu0 %v653_v0  ;;  %v656_v2 = vld [vmem:[#allocation7 + $0x24] ss:$16 sps:$4 sm:$0xff]   ;;  %v658_v3 = vld [vmem:[#allocation7 + $0x20] ss:$16 sps:$4 sm:$0xff]   ;;  %v56_v13 = vld [vmem:[#allocation2 + $0x8] sm:$0xff]  ;;  %s852_s26 = smov [#allocation8]  }
  0x38   :  { %450 = vmatpush1.bf16.msra.mxu0 %v655_v1  ;;  %v659_v4 = vld [vmem:[#allocation7 + $0x44] ss:$16 sps:$4 sm:$0xff]   ;;  %v661_v5 = vld [vmem:[#allocation7 + $0x40] ss:$16 sps:$4 sm:$0xff]   ;;  %v58_v14 = vld [vmem:[#allocation5 + $0x8] sm:$0xff]  ;;  %s572_s27 = sshll.u32 %s852_s26, 4  ;;  %s573_s27 = int_to_ptr.vmem [resolvable:$true] %s572_s27 }
  0x39   :  { %451 = vmatprep.subr.bf16.mxu0 %v656_v2  ;;  %v662_v6 = vld [vmem:[#allocation7 + $0x64] ss:$16 sps:$4 sm:$0xff]   ;;  %v664_v7 = vld [vmem:[#allocation7 + $0x60] ss:$16 sps:$4 sm:$0xff]   ;;  %v60_v17 = vadd.f32 %v58_v14, %v56_v13  ;;  %v701_v18 = vld [vmem:[#allocation7 + $0xc] ss:$16 sps:$4 sm:$0xff]   ;;  %p824_p11 = scmp.lt.s32.totalorder %s573_s27, %s573_s27 }
  0x3a   :  { %v665_v8 = vld [vmem:[#allocation7 + $0x84] ss:$16 sps:$4 sm:$0xff]   ;;  %v667_v9 = vld [vmem:[#allocation7 + $0x80] ss:$16 sps:$4 sm:$0xff]   ;;  %v703_v19 = vld [vmem:[#allocation7 + $0x8] ss:$16 sps:$4 sm:$0xff]   ;;  %490 = vmatprep.subr.bf16.mxu1 %v701_v18 }
  0x3b   :  { %v668_v10 = vld [vmem:[#allocation7 + $0xa4] ss:$16 sps:$4 sm:$0xff]   ;;  %v670_v11 = vld [vmem:[#allocation7 + $0xa0] ss:$16 sps:$4 sm:$0xff]   ;;  %v914_v20 = vmul.f32 0.5, %v60_v17  ;;  %491 = vmatpush1.bf16.msra.mxu1 %v703_v19 }
  0x3c   :  { %452 = vmatpush1.bf16.msra.mxu0 %v658_v3  ;;  %v671_v12 = vld [vmem:[#allocation7 + $0xc4] ss:$16 sps:$4 sm:$0xff]   ;;  %v673_v15 = vld [vmem:[#allocation7 + $0xc0] ss:$16 sps:$4 sm:$0xff]   ;;  %v704_v21 = vld [vmem:[#allocation7 + $0x2c] ss:$16 sps:$4 sm:$0xff]  }
  0x3d   :  { %453 = vmatprep.subr.bf16.mxu0 %v659_v4  ;;  %v674_v16 = vld [vmem:[#allocation7 + $0xe4] ss:$16 sps:$4 sm:$0xff]   ;;  %v64_v22 = vpack.c.bf16 %v914_v20, %v914_v20  ;;  %v706_v23 = vld [vmem:[#allocation7 + $0x28] ss:$16 sps:$4 sm:$0xff]   ;;  %v676_v24 = vld [vmem:[#allocation7 + $0xe0] ss:$16 sps:$4 sm:$0xff]   ;;  %492 = vmatprep.subr.bf16.mxu1 %v704_v21  ;;  %v532_v18 = vmul.f32 %v914_v20, %v914_v20 }
  0x3e   :  { %v707_v25 = vld [vmem:[#allocation7 + $0x4c] ss:$16 sps:$4 sm:$0xff]   ;;  %v677_v26 = vld [vmem:[#allocation7 + $0x104] ss:$16 sps:$4 sm:$0xff]   ;;  %v709_v27 = vld [vmem:[#allocation7 + $0x48] ss:$16 sps:$4 sm:$0xff]  }
  0x3f   :  { %481 = vmatprep.mubr.bf16.mxu0 %v64_v22  ;;  %522 = vmatprep.mubr.bf16.mxu1 %v64_v22  ;;  %v679_v28 = vld [vmem:[#allocation7 + $0x100] ss:$16 sps:$4 sm:$0xff]   ;;  %v710_v29 = vld [vmem:[#allocation7 + $0x6c] ss:$16 sps:$4 sm:$0xff]   ;;  %v680_v30 = vld [vmem:[#allocation7 + $0x124] ss:$16 sps:$4 sm:$0xff]  }
  0x40   :  { %454 = vmatpush1.bf16.msra.mxu0 %v661_v5  ;;  %493 = vmatpush1.bf16.msra.mxu1 %v706_v23  ;;  %v712_v31 = vld [vmem:[#allocation7 + $0x68] ss:$16 sps:$4 sm:$0xff]   ;;  %v682_v32 = vld [vmem:[#allocation7 + $0x120] ss:$16 sps:$4 sm:$0xff]   ;;  %v713_v33 = vld [vmem:[#allocation7 + $0x8c] ss:$16 sps:$4 sm:$0xff]  }
  0x41   :  { %455 = vmatprep.subr.bf16.mxu0 %v662_v6  ;;  %494 = vmatprep.subr.bf16.mxu1 %v707_v25  ;;  %v683_v34 = vld [vmem:[#allocation7 + $0x144] ss:$16 sps:$4 sm:$0xff]   ;;  %v715_v35 = vld [vmem:[#allocation7 + $0x88] ss:$16 sps:$4 sm:$0xff]   ;;  %v685_v36 = vld [vmem:[#allocation7 + $0x140] ss:$16 sps:$4 sm:$0xff]  }
  0x42   :  { %v716_v37 = vld [vmem:[#allocation7 + $0xac] ss:$16 sps:$4 sm:$0xff]   ;;  %v686_v38 = vld [vmem:[#allocation7 + $0x164] ss:$16 sps:$4 sm:$0xff]   ;;  %v718_v39 = vld [vmem:[#allocation7 + $0xa8] ss:$16 sps:$4 sm:$0xff]  }
  0x43   :  { %v688_v40 = vld [vmem:[#allocation7 + $0x160] ss:$16 sps:$4 sm:$0xff]   ;;  %v719_v41 = vld [vmem:[#allocation7 + $0xcc] ss:$16 sps:$4 sm:$0xff]   ;;  %v689_v42 = vld [vmem:[#allocation7 + $0x184] ss:$16 sps:$4 sm:$0xff]  }
  0x44   :  { %456 = vmatpush1.bf16.msra.mxu0 %v664_v7  ;;  %495 = vmatpush1.bf16.msra.mxu1 %v709_v27  ;;  %v721_v43 = vld [vmem:[#allocation7 + $0xc8] ss:$16 sps:$4 sm:$0xff]   ;;  %v691_v44 = vld [vmem:[#allocation7 + $0x180] ss:$16 sps:$4 sm:$0xff]   ;;  %v722_v45 = vld [vmem:[#allocation7 + $0xec] ss:$16 sps:$4 sm:$0xff]  }
  0x45   :  { %457 = vmatprep.subr.bf16.mxu0 %v665_v8  ;;  %496 = vmatprep.subr.bf16.mxu1 %v710_v29  ;;  %v692_v46 = vld [vmem:[#allocation7 + $0x1a4] ss:$16 sps:$4 sm:$0xff]   ;;  %v694_v47 = vld [vmem:[#allocation7 + $0x1a0] ss:$16 sps:$4 sm:$0xff]   ;;  %v724_v48 = vld [vmem:[#allocation7 + $0xe8] ss:$16 sps:$4 sm:$0xff]  }
  0x46   :  { %v55_v49 = vld [vmem:[#allocation2] sm:$0xff]  ;;  %v57_v50 = vld [vmem:[#allocation5] sm:$0xff]  ;;  %v725_v51 = vld [vmem:[#allocation7 + $0x10c] ss:$16 sps:$4 sm:$0xff]  }
  0x47   :  { %v695_v52 = vld [vmem:[#allocation7 + $0x1c4] ss:$16 sps:$4 sm:$0xff]   ;;  %v59_v53 = vadd.f32 %v57_v50, %v55_v49  ;;  %v727_v54 = vld [vmem:[#allocation7 + $0x108] ss:$16 sps:$4 sm:$0xff]   ;;  %v697_v55 = vld [vmem:[#allocation7 + $0x1c0] ss:$16 sps:$4 sm:$0xff]  }
  0x48   :  { %458 = vmatpush1.bf16.msra.mxu0 %v667_v9  ;;  %497 = vmatpush1.bf16.msra.mxu1 %v712_v31  ;;  %v728_v56 = vld [vmem:[#allocation7 + $0x12c] ss:$16 sps:$4 sm:$0xff]   ;;  %v698_v57 = vld [vmem:[#allocation7 + $0x1e4] ss:$16 sps:$4 sm:$0xff]   ;;  %v730_v59 = vld [vmem:[#allocation7 + $0x128] ss:$16 sps:$4 sm:$0xff]  }
  0x49   :  { %459 = vmatprep.subr.bf16.mxu0 %v668_v10  ;;  %498 = vmatprep.subr.bf16.mxu1 %v713_v33  ;;  %v61_v58 = vmul.f32 0.5, %v59_v53  ;;  %v700_v60 = vld [vmem:[#allocation7 + $0x1e0] ss:$16 sps:$4 sm:$0xff]   ;;  %v731_v61 = vld [vmem:[#allocation7 + $0x14c] ss:$16 sps:$4 sm:$0xff]  }
  0x4a   :  { %v733_v63 = vld [vmem:[#allocation7 + $0x148] ss:$16 sps:$4 sm:$0xff]   ;;  %v734_v0 = vld [vmem:[#allocation7 + $0x16c] ss:$16 sps:$4 sm:$0xff]   ;;  %v646_v29 = vld [vmem:[%s939_s3] ss:$0 sm:$0xff] }
  0x4b   :  { %v63_v62 = vpack.c.bf16 %v61_v58, %v61_v58  ;;  %v736_v1 = vld [vmem:[#allocation7 + $0x168] ss:$16 sps:$4 sm:$0xff]   ;;  %v737_v2 = vld [vmem:[#allocation7 + $0x18c] ss:$16 sps:$4 sm:$0xff]   ;;  %v531_v17 = vmul.f32 %v61_v58, %v61_v58  ;;  %s819_s3 = scalar_lea.vmem %s573_s27, 128 }
  0x4c   :  { %460 = vmatpush1.bf16.msra.mxu0 %v670_v11  ;;  %499 = vmatpush1.bf16.msra.mxu1 %v715_v35  ;;  %v739_v3 = vld [vmem:[#allocation7 + $0x188] ss:$16 sps:$4 sm:$0xff]   ;;  %v740_v4 = vld [vmem:[#allocation7 + $0x1ac] ss:$16 sps:$4 sm:$0xff]   ;;  %p820_p10 = scmp.ne.s32.totalorder %s573_s27, %s819_s3  ;;  %p825_p12 = scmp.lt.s32.totalorder %s819_s3, %s819_s3 }
  0x4d   :  { %461 = vmatprep.subr.bf16.mxu0 %v671_v12  ;;  %500 = vmatprep.subr.bf16.mxu1 %v716_v37  ;;  %v742_v5 = vld [vmem:[#allocation7 + $0x1a8] ss:$16 sps:$4 sm:$0xff]   ;;  %v743_v6 = vld [vmem:[#allocation7 + $0x1cc] ss:$16 sps:$4 sm:$0xff]   ;;  %v533_v23 = vadd.f32 %v532_v18, %v531_v17 }
  0x4e   :  { %v745_v7 = vld [vmem:[#allocation7 + $0x1c8] ss:$16 sps:$4 sm:$0xff]   ;;  %v746_v8 = vld [vmem:[#allocation7 + $0x1ec] ss:$16 sps:$4 sm:$0xff]   ;;  %p826_p13 = por %p825_p12, %p824_p11 }
  0x4f   :  { %v748_v9 = vld [vmem:[#allocation7 + $0x1e8] ss:$16 sps:$4 sm:$0xff]  }
  0x50   :  { %462 = vmatpush1.bf16.msra.mxu0 %v673_v15  ;;  %501 = vmatpush1.bf16.msra.mxu1 %v718_v39  ;;  %p827_p0 = pnand %p826_p13, %p820_p10 }
  0x51   :  { %463 = vmatprep.subr.bf16.mxu0 %v674_v16  ;;  %502 = vmatprep.subr.bf16.mxu1 %v719_v41 }
  0x54   :  { %464 = vmatpush1.bf16.msra.mxu0 %v676_v24  ;;  %503 = vmatpush1.bf16.msra.mxu1 %v721_v43 }
  0x55   :  { %465 = vmatprep.subr.bf16.mxu0 %v677_v26  ;;  %504 = vmatprep.subr.bf16.mxu1 %v722_v45 }
  0x58   :  { %466 = vmatpush1.bf16.msra.mxu0 %v679_v28  ;;  %505 = vmatpush1.bf16.msra.mxu1 %v724_v48 }
  0x59   :  { %467 = vmatprep.subr.bf16.mxu0 %v680_v30  ;;  %506 = vmatprep.subr.bf16.mxu1 %v725_v51 }
  0x5c   :  { %468 = vmatpush1.bf16.msra.mxu0 %v682_v32  ;;  %507 = vmatpush1.bf16.msra.mxu1 %v727_v54 }
  0x5d   :  { %469 = vmatprep.subr.bf16.mxu0 %v683_v34  ;;  %508 = vmatprep.subr.bf16.mxu1 %v728_v56 }
  0x60   :  { %470 = vmatpush1.bf16.msra.mxu0 %v685_v36  ;;  %509 = vmatpush1.bf16.msra.mxu1 %v730_v59 }
  0x61   :  { %471 = vmatprep.subr.bf16.mxu0 %v686_v38  ;;  %510 = vmatprep.subr.bf16.mxu1 %v731_v61 }
  0x64   :  { %472 = vmatpush1.bf16.msra.mxu0 %v688_v40  ;;  %511 = vmatpush1.bf16.msra.mxu1 %v733_v63 }
  0x65   :  { %473 = vmatprep.subr.bf16.mxu0 %v689_v42  ;;  %512 = vmatprep.subr.bf16.mxu1 %v734_v0 }
  0x68   :  { %474 = vmatpush1.bf16.msra.mxu0 %v691_v44  ;;  %513 = vmatpush1.bf16.msra.mxu1 %v736_v1 }
  0x69   :  { %475 = vmatprep.subr.bf16.mxu0 %v692_v46  ;;  %514 = vmatprep.subr.bf16.mxu1 %v737_v2 }
  0x6c   :  { %476 = vmatpush1.bf16.msra.mxu0 %v694_v47  ;;  %515 = vmatpush1.bf16.msra.mxu1 %v739_v3 }
  0x6d   :  { %477 = vmatprep.subr.bf16.mxu0 %v695_v52  ;;  %516 = vmatprep.subr.bf16.mxu1 %v740_v4 }
  0x70   :  { %478 = vmatpush1.bf16.msra.mxu0 %v697_v55  ;;  %517 = vmatpush1.bf16.msra.mxu1 %v742_v5 }
  0x71   :  { %479 = vmatprep.subr.bf16.mxu0 %v698_v57  ;;  %518 = vmatprep.subr.bf16.mxu1 %v743_v6 }
  0x74   :  { %480 = vmatpush1.bf16.msra.mxu0 %v700_v60  ;;  %519 = vmatpush1.bf16.msra.mxu1 %v745_v7 }
  0x75   :  { %520 = vmatprep.subr.bf16.mxu1 %v746_v8 }
  0x77   :  { %482 = vmatmul.mubr.bf16.vlgmr.msra.gmra.mrb[0].mxu0 %v63_v62 }
  0x78   :  { %521 = vmatpush1.bf16.msra.mxu1 %v748_v9 }
  0x7b   :  { %523 = vmatmul.mubr.bf16.vlgmr.msra.gmra.mrb[0].mxu1 %v63_v62 }
 0x14a   :  { %v483_v10 = vpop.f32.mrb[0].mxu0 }
 0x14b   :  { %v538_v11 = vmul.f32 %v483_v10, %v61_v58  ;;  %v543_v12 = vmul.f32 %v483_v10, %v483_v10  ;;  %v485_v13 = vpop.f32.mrb[1].mxu0 }
 0x14c   :  { %v539_v14 = vmul.f32 %v485_v13, %v914_v20  ;;  %v544_v15 = vmul.f32 %v485_v13, %v485_v13  ;;  %v487_v16 = vpop.f32.mrb[2].mxu0 }
 0x14d   :  { %v488_v19 = vpop.f32.mrb[3].mxu0 }
 0x14e   :  { %v545_v21 = vadd.f32 %v544_v15, %v543_v12  ;;  %v540_v22 = vadd.f32 %v539_v14, %v538_v11  ;;  %v524_v24 = vpop.f32.mrb[0].mxu1 }
 0x14f   :  { %v526_v25 = vpop.f32.mrb[1].mxu1 }
 0x150   :  { %546 = vadd.xlane.f32.xlu0 %v545_v21  ;;  %541 = vadd.xlane.f32.xlu1 %v540_v22  ;;  %v528_v26 = vpop.f32.mrb[2].mxu1  ;;  %v551_v28 = vmul.f32 2.0, %v526_v25 }
 0x151   :  { %v529_v27 = vpop.f32.mrb[3].mxu1 }
 0x152   :  { %v558_v30 = vadd.f32 %v646_v29, %v551_v28 }
 0x154   :  { %534 = vadd.xlane.f32.xlu0 %v533_v23 }
 0x1dd   :  { %v547_v31 = vpop.xlane.xlu0 %546  ;;  %v542_v36 = vpop.xlane.xlu1 %541 }
 0x1de   :  { %v559_v32 = vadd.f32 %v558_v30, %v547_v31  ;;  %v548_v37 = vadd.f32 %v542_v36, %v524_v24 }
 0x1e0   :  { %v560_v20 = vmax.f32 %v559_v32, 0.0 }
 0x1e1   :  { %v535_v33 = vpop.xlane.xlu0 %534 }
 0x1e2   :  { %v536_v34 = vadd.f32 1e-12, %v535_v33  ;;  %v561_v35 = vadd.f32 1e-12, %v560_v20 }
 0x1e4   :  { %749 = vrsqrt.f32 %v536_v34 }
 0x1e5   :  { %751 = vrsqrt.f32 %v561_v35 }
 0x1ee   :  { %v750_v38 = vpop.eup %749 }
 0x1ef   :  { %v549_v39 = vmul.f32 %v750_v38, %v548_v37  ;;  %v752_v40 = vpop.eup %751 }
 0x1f1   :  { %v563_v41 = vmul.f32 %v752_v40, %v549_v39 }
 0x1f3   :  { %v564_v42 = vmul.f32 14.285714, %v563_v41 }
 0x1f5   :  { %565 = vst [vmem:[#allocation8] sm:$0xff] %v564_v42 }
 0x1f6   :  { %830 = shalt.err (!%p827_p0)
}
 0x1f7   :  { %s831_s30 = scalar_lea.hbm %s940_s4, 128 }
 0x1f8   :  { %p832_p1 = scmp.ne.s32.totalorder %s940_s4, %s831_s30  ;;  %p835_p2 = scmp.lt.u32.totalorder %s831_s30, %s940_s4 }
 0x1fa   :  { %p837_p3 = pnand %p835_p2, %p832_p1 }
 0x1fc   :  { %840 = shalt.err (!%p837_p3)
}
 0x1fd   :  { %575 = dma.vmem_to_hbm [thread:$0]  %s573_s27, 128, %s940_s4, [#allocation4]  }
 0x1fe   :  { %845 = dma.done.wait [#allocation4], 128  }
 0x1ff   :  { %846 = vsyncadd [#allocation4], 4294967168 }
 0x200   :  { %579 = vsyncpa [#allocation3], 1 }
 0x201   :  { %580 = vsyncpa [#allocation6], 1 }
 0x202   :  { %581 = vsyncpa [#allocation4], 1 }

</bundles_post_ra>
